<compile_context>
chip_gen: v6e
topology: v6e:2x2x1
jax: 0.10.0
libtpu: 0.0.40
codegen_flags: <defaults>
</compile_context>

<pallas_src>
import functools
import math

import jax
import jax.numpy as jnp
from jax.experimental import pallas as pl
from jax.experimental.pallas import tpu as pltpu


def _round_up(x: int, m: int) -> int:
    return ((x + m - 1) // m) * m


# ----------------------------- Pallas kernel ---------------------------------

def _matmul_bias_kernel(x_ref, w_ref, b_ref, o_ref):
    # x_ref: (tm, V) f32, w_ref: (V, tn) bf16, b_ref: (1, tn) f32, o_ref: (tm, tn) f32
    x = x_ref[...].astype(jnp.bfloat16)          # in-kernel cast: free VPU work under the MXU
    acc = jnp.dot(x, w_ref[...], preferred_element_type=jnp.float32)
    o_ref[...] = (acc + b_ref[...]).astype(o_ref.dtype)


def matmul_bias_pallas(x, w, b, *, tm, tn, vmem_limit_bytes):
    """out = x @ w + b, tiled (tm x tn), W resident across the inner (row) grid axis.

    Preconditions (caller pads to satisfy them):
      x: (B, V) f32 with B % tm == 0 and tm % 8 == 0
      w: (V, N) bf16 with N % tn == 0 and tn % 128 == 0
      b: (1, N) f32
    """
    B, V = x.shape
    Vw, N = w.shape
    assert V == Vw and b.shape == (1, N)
    assert B % tm == 0 and tm % 8 == 0
    assert N % tn == 0 and tn % 128 == 0

    n_col, n_row = N // tn, B // tm
    cost = pl.CostEstimate(
        flops=2 * B * V * N,
        transcendentals=0,
        # x is re-read once per column tile; W/bias exactly once; output written once.
        bytes_accessed=(n_col * B * V * x.dtype.itemsize
                        + V * N * w.dtype.itemsize + N * 4 + B * N * 4),
    )
    # Column axis OUTER, row axis INNER: the W/bias block index does not change between
    # consecutive grid steps, so Pallas skips the re-DMA and the weights stay VMEM-resident.
    return pl.pallas_call(
        _matmul_bias_kernel,
        out_shape=jax.ShapeDtypeStruct((B, N), jnp.float32),
        grid=(n_col, n_row),
        in_specs=[
            pl.BlockSpec((tm, V), lambda j, i: (i, 0)),
            pl.BlockSpec((V, tn), lambda j, i: (0, j)),
            pl.BlockSpec((1, tn), lambda j, i: (0, j)),
        ],
        out_specs=pl.BlockSpec((tm, tn), lambda j, i: (i, j)),
        compiler_params=pltpu.CompilerParams(
            dimension_semantics=("parallel", "parallel"),
            vmem_limit_bytes=vmem_limit_bytes),
        cost_estimate=cost,
    )(x, w, b)


# ------------------------- tile-size selection --------------------------------

_VMEM_BUDGET_BYTES = 12 * 1024 * 1024   # sized under v5e's 16 MiB scoped-VMEM default
_TM_MAX = 512                           # bigger row tiles amortize per-step overhead
_TN_MAX = 1024                          # lane-dense output tile target


def _working_set_bytes(tm, tn, v):
    # double-buffered: f32 x tile, bf16 w tile, f32 bias tile, f32 out tile
    return 2 * (tm * v * 4 + v * tn * 2 + tn * 4 + tm * tn * 4)


def _vmem_limit_bytes(tm, tn, v):
    ws = _working_set_bytes(tm, tn, v)
    # explicit limit: generous headroom, well under v7x's 64 MiB physical VMEM
    return min(48 * 1024 * 1024, max(16 * 1024 * 1024, _round_up(2 * ws, 1 << 20)))


def _choose_col_tile(vec_len, n):
    """Widest lane-dense (multiple-of-128) column tile fitting the VMEM budget; N is padded
    up to a multiple of it (no divisibility constraint on the original N)."""
    n128 = _round_up(n, 128)
    tn = _round_up(min(_TN_MAX, n128), 128)
    while tn > 128 and _working_set_bytes(_TM_MAX, tn, vec_len) > _VMEM_BUDGET_BYTES:
        tn -= 128
    n_pad = _round_up(n128, tn)
    return tn, n_pad


def _choose_row_tile(batch):
    """Largest multiple-of-8 row tile <= _TM_MAX that keeps row padding minimal."""
    b8 = _round_up(max(batch, 1), 8)
    best_tm, best_pad = 8, _round_up(b8, 8)
    tm = 8
    while tm <= min(_TM_MAX, b8):
        bp = _round_up(b8, tm)
        if bp < best_pad or (bp == best_pad and tm > best_tm):
            best_tm, best_pad = tm, bp
        tm += 8
    return best_tm, best_pad


# ----------------------------- jitted forward ---------------------------------

@functools.partial(jax.jit, static_argnames=("tm", "b_pad", "tn", "n", "fm", "dim"))
def _v2fm_forward(x, w, b, *, tm, b_pad, tn, n, fm, dim):
    B, V = x.shape
    if b_pad != B:
        x = jnp.pad(x, ((0, b_pad - B), (0, 0)))
    y = matmul_bias_pallas(x, w, b, tm=tm, tn=tn,
                           vmem_limit_bytes=_vmem_limit_bytes(tm, tn, V))
    y = y[:B, :n]
    return y.reshape(B, fm, dim, dim)   # NCHW


# --------------------------- module equivalent --------------------------------

class Vector2FeatureMapsPallas:
    """JAX/Pallas re-implementation of the PyTorch Vector2FeatureMaps module."""

    def __init__(self, vec_len, feature_maps, mode, fm_dim=4, kernel_size=4,
                 key=jax.random.PRNGKey(0)):
        self.vec_len = vec_len
        self.feature_maps = feature_maps
        self.mode = mode
        k_w, k_b = jax.random.split(key)

        if mode == 'convtransposed':
            self.out_dim = kernel_size
            # nn.ConvTranspose2d weight: (in_channels, out_channels, kH, kW); PyTorch default init
            # uses fan_in = weight.size(1) * kH * kW = out_channels * K * K.
            fan_in = feature_maps * kernel_size * kernel_size
            bound = 1.0 / math.sqrt(fan_in)
            w_ct = jax.random.uniform(
                k_w, (vec_len, feature_maps, kernel_size, kernel_size),
                minval=-bound, maxval=bound, dtype=jnp.float32)
            bias = jax.random.uniform(
                k_b, (feature_maps,), minval=-bound, maxval=bound, dtype=jnp.float32)
            # With a 1x1 spatial input, conv-transpose == matmul over (V, F*K*K).
            w2d = w_ct.reshape(vec_len, feature_maps * kernel_size * kernel_size)
            b2d = jnp.repeat(bias, kernel_size * kernel_size).reshape(1, -1)
        elif mode == 'linear':
            self.out_dim = fm_dim
            out_features = feature_maps * fm_dim * fm_dim
            bound = 1.0 / math.sqrt(vec_len)   # nn.Linear: fan_in = in_features
            w_lin = jax.random.uniform(
                k_w, (out_features, vec_len), minval=-bound, maxval=bound,
                dtype=jnp.float32)
            bias = jax.random.uniform(
                k_b, (out_features,), minval=-bound, maxval=bound, dtype=jnp.float32)
            w2d = w_lin.T                       # (V, N)
            b2d = bias.reshape(1, out_features)
        else:
            raise RuntimeError('norm argument has unknown value: ' + mode)

        # Lane-dense padding of the N axis, done once offline. Weights streamed as bf16
        # (weight-bandwidth bound at small batch); bias stays f32 (added to f32 MXU accumulator).
        self.n = w2d.shape[1]
        self.tn, self.n_pad = _choose_col_tile(vec_len, self.n)
        pad_n = self.n_pad - self.n
        self.w2d = jnp.pad(w2d, ((0, 0), (0, pad_n))).astype(jnp.bfloat16)
        self.b2d = jnp.pad(b2d, ((0, 0), (0, pad_n))).astype(jnp.float32)

    def __call__(self, inp):
        # inp: (B, vec_len) f32
        B = inp.shape[0]
        tm, b_pad = _choose_row_tile(B)
        tn = self.tn
        # v7x: if the grid would be a single step, split the column axis so the 2nd TC gets work.
        if b_pad // tm == 1 and self.n_pad // tn == 1 and tn % 256 == 0:
            tn //= 2
        return _v2fm_forward(inp, self.w2d, self.b2d,
                             tm=tm, b_pad=b_pad, tn=tn, n=self.n,
                             fm=self.feature_maps, dim=self.out_dim)


# --------------------------------- main ---------------------------------------

if __name__ == "__main__":
    key = jax.random.PRNGKey(0)
    k_x, k_m1, k_m2 = jax.random.split(key, 3)

    B, vec_len, feature_maps = 2, 32, 4
    x = jax.random.normal(k_x, (B, vec_len), dtype=jnp.float32)

    ok = True
    for mode, k_m in (('convtransposed', k_m1), ('linear', k_m2)):
        mod = Vector2FeatureMapsPallas(vec_len, feature_maps, mode,
                                       fm_dim=4, kernel_size=4, key=k_m)
        out = jax.block_until_ready(mod(x))
        assert out.shape == (B, feature_maps, mod.out_dim, mod.out_dim)

        # Pure-JAX reference with the same (bf16-stored) parameters.
        w_ref = mod.w2d[:, :mod.n].astype(jnp.float32)
        b_ref = mod.b2d[:, :mod.n]
        ref = (x.astype(jnp.bfloat16).astype(jnp.float32) @ w_ref + b_ref).reshape(
            B, feature_maps, mod.out_dim, mod.out_dim)
        ok &= bool(jnp.allclose(out, ref, atol=1e-4, rtol=1e-4))

    if ok:
        print("KERNEL_OK")
</pallas_src>

<mosaic_0001>
module attributes {stable_mosaic.version = 11 : i64} {
  func.func @_matmul_bias_kernel(%arg0: i32, %arg1: i32, %arg2: memref<8x32xf32, #tpu.memory_space<vmem>>, %arg3: memref<32x128xbf16, #tpu.memory_space<vmem>>, %arg4: memref<1x128xf32, #tpu.memory_space<vmem>>, %arg5: memref<8x128xf32, #tpu.memory_space<vmem>>) attributes {dimension_semantics = [#tpu.dimension_semantics<parallel>, #tpu.dimension_semantics<parallel>], iteration_bounds = array<i64: 1, 1>, scalar_prefetch = 0 : i64, scratch_operands = 0 : i64, tpu.core_type = #tpu.core_type<tc>, window_params = [{transform_indices = @transform_0, window_bounds = array<i64: 8, 32>}, {transform_indices = @transform_1, window_bounds = array<i64: 32, 128>}, {transform_indices = @transform_2, window_bounds = array<i64: 1, 128>}, {transform_indices = @transform_3, window_bounds = array<i64: 8, 128>}]} {
    %c0 = arith.constant 0 : index
    %c0_0 = arith.constant 0 : index
    %0 = vector.load %arg2[%c0, %c0_0] : memref<8x32xf32, #tpu.memory_space<vmem>>, vector<8x32xf32>
    %1 = arith.truncf %0 : vector<8x32xf32> to vector<8x32xbf16>
    %c0_1 = arith.constant 0 : index
    %c0_2 = arith.constant 0 : index
    %2 = vector.load %arg3[%c0_1, %c0_2] : memref<32x128xbf16, #tpu.memory_space<vmem>>, vector<32x128xbf16>
    %cst = arith.constant dense<0.000000e+00> : vector<8x128xf32>
    %3 = tpu.matmul %1, %2, %cst {dimension_numbers = #tpu.dot_dimension_numbers<[1], [0], [0], [1], [0, 0, 1, 1], [], []>} : vector<8x32xbf16>, vector<32x128xbf16>, vector<8x128xf32> -> vector<8x128xf32>
    %c0_3 = arith.constant 0 : index
    %c0_4 = arith.constant 0 : index
    %4 = vector.load %arg4[%c0_3, %c0_4] : memref<1x128xf32, #tpu.memory_space<vmem>>, vector<1x128xf32>
    %5 = vector.broadcast %4 : vector<1x128xf32> to vector<8x128xf32>
    %6 = arith.addf %3, %5 : vector<8x128xf32>
    %c0_5 = arith.constant 0 : index
    %c0_6 = arith.constant 0 : index
    %7 = vector.load %arg5[%c0_5, %c0_6] : memref<8x128xf32, #tpu.memory_space<vmem>>, vector<8x128xf32>
    tpu.vector_store %arg5[%c0_5, %c0_6], %6 {strides = array<i32>} : memref<8x128xf32, #tpu.memory_space<vmem>>, vector<8x128xf32>,
    return
  }
  func.func @transform_0(%arg0: i32, %arg1: i32) -> (i32, i32) {
    %c0_i32 = arith.constant 0 : i32
    %c0_i32_0 = arith.constant 0 : i32
    return %arg1, %c0_i32 : i32, i32
  }
  func.func @transform_1(%arg0: i32, %arg1: i32) -> (i32, i32) {
    %c0_i32 = arith.constant 0 : i32
    %c0_i32_0 = arith.constant 0 : i32
    return %c0_i32, %arg0 : i32, i32
  }
  func.func @transform_2(%arg0: i32, %arg1: i32) -> (i32, i32) {
    %c0_i32 = arith.constant 0 : i32
    %c0_i32_0 = arith.constant 0 : i32
    return %c0_i32, %arg0 : i32, i32
  }
  func.func @transform_3(%arg0: i32, %arg1: i32) -> (i32, i32) {
    %c0_i32 = arith.constant 0 : i32
    return %arg1, %arg0 : i32, i32
  }
}

</mosaic_0001>

<bundles_post_ra>
// kernel: _v2fm_forward.1
= control target key start
LH: loop header
LB: loop body
LE: loop exit
PB: predicated region body
PF: predicated region fallthrough
CT: control target
= control target key end

     0   :  { %8 = vsyncpa [#allocation3], 0  ;;  %s148_s12 = smov [#allocation2]   ;;  %s185_s0 = inlined_call_operand.vmem [shape: f32[8,32], index: 0, kind: input, shape index: {}]   ;;  %s186_s1 = inlined_call_operand.hbm [shape: bf16[32,128], index: 1, kind: input, shape index: {}]   ;;  %s187_s2 = inlined_call_operand.vmem [shape: f32[1,128], index: 2, kind: input, shape index: {}]   ;;  %s188_s3 = inlined_call_operand.vmem [shape: f32[8,128], index: 3, kind: output, shape index: {}]  }
   0x1   :  { %s16_s13 = sshll.u32 %s148_s12, 4  ;;  %s17_s13 = int_to_ptr.vmem [resolvable:$true] %s16_s13 }
   0x2   :  { %s134_s14 = scalar_lea.vmem %s17_s13, 256  ;;  %p139_p1 = scmp.lt.s32.totalorder %s17_s13, %s17_s13 }
   0x3   :  { %p135_p0 = scmp.ne.s32.totalorder %s17_s13, %s134_s14  ;;  %p140_p2 = scmp.lt.s32.totalorder %s134_s14, %s134_s14 }
   0x5   :  { %p141_p3 = por %p140_p2, %p139_p1 }
   0x7   :  { %p142_p4 = pnand %p141_p3, %p135_p0 }
   0x9   :  { %145 = shalt.err (!%p142_p4)
}
   0xa   :  { %s149_s15 = smov 64   ;;  %s150_s16 = smov 4  }
   0xb   :  { %22 = dma.hbm_to_vmem [thread:$0]  %s186_s1, 256, %s17_s13, [#allocation3], %s149_s15, %s149_s15, %s150_s16  }
   0xc   :  { %146 = dma.done.wait [#allocation3], 256  }
   0xd   :  { %147 = vsyncadd [#allocation3], 4294967040  ;;  %v151_v0 = vmov 0.0   ;;  %vm152_vm0 = vmmov 0   ;;  %v124_v1 = vld [vmem:[#allocation2 + $0x8] sm:$0xff]   ;;  %v125_v2 = vld [vmem:[#allocation2] sm:$0xff]  }
   0xe   :  { %111 = vmatprep.subr.bf16.mxu0 %v151_v0  ;;  %115 = vmatprep.mubr.msk.bf16.mxu0 %vm152_vm0, %v151_v0  ;;  %v29_v3 = vld [vmem:[%s185_s0] sm:$0xff]  ;;  %vm54_vm1 = vcmask 261120  }
   0xf   :  { %112 = vmatpush3.bf16.msra.mxu0 %v124_v1  ;;  %v30_v4 = vpack.c.bf16 %v29_v3, %v29_v3  ;;  %v104_v5 = vld [vmem:[%s187_s2] ss:$0 sm:$0xff] }
  0x10   :  { %113 = vmatprep.subr.bf16.mxu0 %v151_v0 }
  0x13   :  { %114 = vmatpush3.bf16.msra.mxu0 %v125_v2 }
  0x16   :  { %116 = vmatmul.mubr.msk.bf16.vlgmr.msra.gmra.mxu0 %vm54_vm1, %v30_v4 }
  0xd6   :  { %v92_v6 = vpop.f32.mrf.mxu0 }
  0xd7   :  { %v93_v7 = vadd.f32 %v104_v5, %v92_v6 }
  0xd8   :  { %v117_v8 = vpop.f32.mrf.mxu0 }
  0xd9   :  { %98 = vst [vmem:[%s188_s3] sm:$0xff] %v93_v7 }
  0xda   :  { %v95_v9 = vpop.f32.mrf.mxu0 }
  0xdc   :  { %v118_v10 = vpop.f32.mrf.mxu0 }
  0xdd   :  { %103 = vsyncpa [#allocation3], 1 }

</bundles_post_ra>
